<compile_context>
chip_gen: v6e
topology: v6e:2x2x1
jax: 0.10.0
libtpu: 0.0.40
codegen_flags: <defaults>
</compile_context>

<pallas_src>
import jax
import jax.numpy as jnp
from jax.experimental import pallas as pl
from jax.experimental.pallas import tpu as pltpu


_MIN_PALLAS_BYTES = 512 * 1024      # below this, pallas_call overhead dominates -> plain jnp
_MAX_TN = 8192                      # lane-tile cap (multiple of 128) for truly huge N
_LANE_CANDIDATES = (8192, 4096, 2048, 1024, 512, 256, 128)


def _jumprelu_kernel(thr_ref, x_ref, o_ref):
    # thr_ref: SMEM scalar-prefetch ref, shape (1,), float32.
    # x_ref / o_ref: VMEM tiles of shape (tm, tn).
    x = x_ref[...]
    thr = thr_ref[0]
    # Compare in the promoted dtype (matches torch promotion when x is bf16 and
    # threshold is f32); multiply in x.dtype to preserve NaN propagation.
    cmp_dtype = jnp.promote_types(x.dtype, thr.dtype)
    gate = (x.astype(cmp_dtype) > thr.astype(cmp_dtype)).astype(x.dtype)
    o_ref[...] = x * gate


def _detect_tiling_config():
    """Return (tile_target_bytes, vmem_limit_bytes) for the local TPU generation."""
    vmem_phys = None
    try:
        info = pltpu.get_tpu_info()
        for attr in ("vmem_capacity_bytes", "vmem_bytes", "vmem_size_bytes"):
            v = getattr(info, attr, None)
            if isinstance(v, int) and v > 0:
                vmem_phys = v
                break
    except Exception:
        pass
    if vmem_phys is not None and vmem_phys > 64 * 1024 * 1024:
        # v5e / v6e (128 MiB physical VMEM): 4 MiB tiles already sit near the
        # HBM roofline plateau; double-buffered in+out -> ~16 MiB resident.
        return 4 * 1024 * 1024, 32 * 1024 * 1024
    # v7x (64 MiB per TC) or unknown: fewer, bigger steps since HBM ~3.2 TB/s
    # makes the fixed per-step overhead relatively larger.  8 MiB tiles ->
    # ~32 MiB resident under a 48 MiB limit; also safe on v5e/v6e.
    return 8 * 1024 * 1024, 48 * 1024 * 1024


def _normalize_to_2d(x):
    """Lane-dense 2-D view of x, or None if no cheap lane-dense reshape exists."""
    if x.ndim >= 2 and x.shape[-1] % 128 == 0:
        return x.reshape(-1, x.shape[-1])
    # 1-D / narrow / ragged last dim: flatten and re-chunk into a lane-dense
    # slab so output tiles are full-width unmasked stores.
    total = x.size
    for lane in _LANE_CANDIDATES:
        if total % lane == 0:
            return x.reshape(total // lane, lane)
    if x.ndim >= 2 and x.shape[-1] >= 128:
        # Full-N tiles: interior vregs unmasked, only the lane edge is masked.
        return x.reshape(-1, x.shape[-1])
    return None


def _choose_tiles(M, N, itemsize, target_bytes):
    """Pick a ~target_bytes, lane-dense (tm, tn) block, or None if impossible."""
    sub = max(8, 32 // itemsize)          # packed-sublane granularity: 8 f32 / 16 bf16 / 32 i8
    row_bytes = N * itemsize
    if row_bytes * sub <= target_bytes:
        tn = N                             # full rows: one contiguous HBM region per tile
    elif N % 128 == 0:
        tn = min(N, _MAX_TN)               # tile the lane axis in 128-multiples
    else:
        return None                        # ragged huge lane axis: let XLA handle it
    tm = target_bytes // max(1, tn * itemsize)
    tm = max(sub, (tm // sub) * sub)
    if tm >= M:
        tm = M                             # full-extent block is always legal
    return tm, tn


def jumprelu_forward(x: jax.Array, threshold: jax.Array, bandwidth: float,
                     *, force_pallas: bool = False,
                     tile_target_bytes: int | None = None,
                     vmem_limit_bytes: int | None = None) -> jax.Array:
    """JumpReLU forward: x * (x > threshold). `bandwidth` is a forward no-op."""
    # TODO(synk): bandwidth only matters for the custom backward (STE);
    # the forward ignores it, matching the PyTorch autograd.Function.
    del bandwidth

    thr_f32 = jnp.asarray(threshold, dtype=jnp.float32)

    def _jnp_path(v):
        cmp_dtype = jnp.promote_types(v.dtype, thr_f32.dtype)
        return v * (v.astype(cmp_dtype) > thr_f32.astype(cmp_dtype)).astype(v.dtype)

    if x.size == 0:
        return x

    nbytes = x.size * x.dtype.itemsize
    if nbytes < _MIN_PALLAS_BYTES and not force_pallas:
        return _jnp_path(x)

    if tile_target_bytes is None or vmem_limit_bytes is None:
        auto_target, auto_limit = _detect_tiling_config()
        tile_target_bytes = tile_target_bytes or auto_target
        vmem_limit_bytes = vmem_limit_bytes or auto_limit

    x2 = _normalize_to_2d(x)
    if x2 is None:
        return _jnp_path(x)
    M, N = x2.shape

    tiles = _choose_tiles(M, N, x2.dtype.itemsize, tile_target_bytes)
    if tiles is None:
        return _jnp_path(x)
    tm, tn = tiles
    grid = (pl.cdiv(M, tm), pl.cdiv(N, tn))

    grid_spec = pltpu.PrefetchScalarGridSpec(
        num_scalar_prefetch=1,
        grid=grid,
        in_specs=[pl.BlockSpec((tm, tn), lambda i, j, thr: (i, j))],
        out_specs=pl.BlockSpec((tm, tn), lambda i, j, thr: (i, j)),
    )

    out2 = pl.pallas_call(
        _jumprelu_kernel,
        out_shape=jax.ShapeDtypeStruct((M, N), x2.dtype),
        grid_spec=grid_spec,
        compiler_params=pltpu.CompilerParams(
            dimension_semantics=("parallel", "parallel"),
            vmem_limit_bytes=vmem_limit_bytes,
        ),
    )(thr_f32.reshape((1,)), x2)

    return out2.reshape(x.shape)


if __name__ == "__main__":
    # Deterministic "module init": JumpReLU(threshold=0.03, bandwidth=0.001)
    threshold_init = 0.03
    bandwidth = 0.001
    threshold_param = jnp.asarray(threshold_init, dtype=jnp.float32)  # scalar nn.Parameter

    key = jax.random.PRNGKey(0)
    k1, k2, k3, k4, k5, k6 = jax.random.split(key, 6)

    def ref(x):
        cmp_dtype = jnp.promote_types(x.dtype, threshold_param.dtype)
        return x * (x.astype(cmp_dtype) > threshold_param.astype(cmp_dtype)).astype(x.dtype)

    def check(x, name, **kw):
        out = jax.block_until_ready(jumprelu_forward(x, threshold_param, bandwidth, **kw))
        assert out.shape == x.shape and out.dtype == x.dtype, f"{name}: shape/dtype mismatch"
        assert jnp.allclose(out.astype(jnp.float32), ref(x).astype(jnp.float32)), \
            f"{name}: value mismatch"

    # 1) Tiny 2-D input: dispatcher takes the plain-jnp fast path.
    x_small = jax.random.normal(k1, (8, 256), dtype=jnp.float32)
    check(x_small, "small-jnp")

    # 2) Same tiny input forced through the Pallas kernel (full-extent block).
    check(x_small, "small-pallas", force_pallas=True)

    # 3) 1-D input -> flatten + lane-dense re-chunk path.
    x_1d = jax.random.normal(k2, (16384,), dtype=jnp.float32)
    check(x_1d, "1d-pallas", force_pallas=True)

    # 4) Narrow last dim (64 < 128) -> flatten path avoids masked stores.
    x_narrow = jax.random.normal(k3, (8, 16, 64), dtype=jnp.float32)
    check(x_narrow, "narrow-pallas", force_pallas=True)

    # 5) bf16 activations with f32 threshold (promoted compare), ragged last dim.
    x_bf16 = jax.random.normal(k4, (32, 192), dtype=jnp.bfloat16)
    check(x_bf16, "bf16-pallas", force_pallas=True)

    # 6) Small tile target to exercise a real 2-D grid with a partial row block.
    x_grid = jax.random.normal(k5, (72, 256), dtype=jnp.float32)
    check(x_grid, "grid-pallas", force_pallas=True, tile_target_bytes=32 * 1024)

    # 7) bf16 grid with packed-sublane (16-row) tile rounding and a partial block.
    x_bf16_grid = jax.random.normal(k6, (40, 256), dtype=jnp.bfloat16)
    check(x_bf16_grid, "bf16-grid-pallas", force_pallas=True, tile_target_bytes=16 * 1024)

    print("KERNEL_OK")
</pallas_src>

<mosaic_0001>
module attributes {stable_mosaic.version = 11 : i64} {
  func.func @_jumprelu_kernel(%arg0: i32, %arg1: i32, %arg2: memref<1xf32, #tpu.memory_space<smem>>, %arg3: memref<8x256xf32, #tpu.memory_space<vmem>>, %arg4: memref<8x256xf32, #tpu.memory_space<vmem>>) attributes {dimension_semantics = [#tpu.dimension_semantics<parallel>, #tpu.dimension_semantics<parallel>], iteration_bounds = array<i64: 1, 1>, scalar_prefetch = 1 : i64, scratch_operands = 0 : i64, tpu.core_type = #tpu.core_type<tc>, window_params = [{transform_indices = @transform_0, window_bounds = array<i64: 8, 256>}, {transform_indices = @transform_1, window_bounds = array<i64: 8, 256>}]} {
    %c0 = arith.constant 0 : index
    %c0_0 = arith.constant 0 : index
    %0 = vector.load %arg3[%c0, %c0_0] : memref<8x256xf32, #tpu.memory_space<vmem>>, vector<8x256xf32>
    %c0_1 = arith.constant 0 : index
    %1 = memref.load %arg2[%c0_1] : memref<1xf32, #tpu.memory_space<smem>>
    %2 = vector.broadcast %1 : f32 to vector<8x256xf32>
    %3 = arith.cmpf ogt, %0, %2 : vector<8x256xf32>
    %4 = arith.extui %3 : vector<8x256xi1> to vector<8x256xi32>
    %5 = arith.sitofp %4 : vector<8x256xi32> to vector<8x256xf32>
    %6 = arith.mulf %0, %5 : vector<8x256xf32>
    %c0_2 = arith.constant 0 : index
    %c0_3 = arith.constant 0 : index
    %7 = vector.load %arg4[%c0_2, %c0_3] : memref<8x256xf32, #tpu.memory_space<vmem>>, vector<8x256xf32>
    tpu.vector_store %arg4[%c0_2, %c0_3], %6 {strides = array<i32>} : memref<8x256xf32, #tpu.memory_space<vmem>>, vector<8x256xf32>,
    return
  }
  func.func @transform_0(%arg0: i32, %arg1: i32, %arg2: memref<1xf32, #tpu.memory_space<smem>>) -> (i32, i32) {
    %c0_i32 = arith.constant 0 : i32
    return %arg0, %arg1 : i32, i32
  }
  func.func @transform_1(%arg0: i32, %arg1: i32, %arg2: memref<1xf32, #tpu.memory_space<smem>>) -> (i32, i32) {
    %c0_i32 = arith.constant 0 : i32
    return %arg0, %arg1 : i32, i32
  }
}

</mosaic_0001>

<bundles_post_ra>
// kernel: tpu_custom_call.1
= control target key start
LH: loop header
LB: loop body
LE: loop exit
PB: predicated region body
PF: predicated region fallthrough
CT: control target
= control target key end

     0   :  { %8 = vsyncpa [#allocation5], 0  ;;  %s128_s0 = inlined_call_operand.<no memory space> [shape: f32[1], index: 0, kind: input, shape index: {}]   ;;  %s129_s1 = inlined_call_operand.hbm [shape: f32[8,256], index: 1, kind: input, shape index: {}]   ;;  %s130_s2 = inlined_call_operand.hbm [shape: f32[8,256], index: 2, kind: output, shape index: {}]  }
   0x1   :  { %9 = vsyncpa [#allocation6], 0  ;;  %s101_s9 = smov [#allocation4]  }
   0x2   :  { %s16_s10 = sshll.u32 %s101_s9, 4  ;;  %s17_s10 = int_to_ptr.vmem [resolvable:$true] %s16_s10 }
   0x3   :  { %s65_s11 = scalar_lea.vmem %s17_s10, 256  ;;  %p70_p1 = scmp.lt.s32.totalorder %s17_s10, %s17_s10 }
   0x4   :  { %p66_p0 = scmp.ne.s32.totalorder %s17_s10, %s65_s11  ;;  %p71_p2 = scmp.lt.s32.totalorder %s65_s11, %s65_s11 }
   0x6   :  { %p72_p3 = por %p71_p2, %p70_p1 }
   0x8   :  { %p73_p4 = pnand %p72_p3, %p66_p0 }
   0xa   :  { %76 = shalt.err (!%p73_p4)
}
   0xb   :  { %19 = dma.hbm_to_vmem [thread:$0]  %s129_s1, 256, %s17_s10, [#allocation5]  }
   0xc   :  { %97 = dma.done.wait [#allocation5], 256  }
   0xd   :  { %98 = vsyncadd [#allocation5], 4294967040  ;;  %v26_v0 = vstv %s128_s0  ;;  %v23_v1 = vld [vmem:[#allocation4] sm:$0xff]  ;;  %v24_v2 = vld [vmem:[#allocation4 + $0x8] sm:$0xff]  ;;  %s102_s16 = smov [#allocation7]   ;;  %v103_v3 = vmov 0.0  }
   0xe   :  { %s43_s17 = sshll.u32 %s102_s16, 4  ;;  %vm27_vm0 = vcmp.gt.f32.partialorder %v23_v1, %v26_v0  ;;  %vm28_vm1 = vcmp.gt.f32.partialorder %v24_v2, %v26_v0  ;;  %s44_s17 = int_to_ptr.vmem [resolvable:$true] %s43_s17 }
   0xf   :  { %v52_v4 = vsel %vm27_vm0, 1.0, %v103_v3  ;;  %v53_v5 = vsel %vm28_vm1, 1.0, %v103_v3  ;;  %s77_s1 = scalar_lea.vmem %s44_s17, 256  ;;  %p82_p6 = scmp.lt.s32.totalorder %s44_s17, %s44_s17 }
  0x10   :  { %v33_v6 = vmul.f32 %v52_v4, %v23_v1  ;;  %v34_v7 = vmul.f32 %v53_v5, %v24_v2  ;;  %p78_p5 = scmp.ne.s32.totalorder %s44_s17, %s77_s1  ;;  %p83_p7 = scmp.lt.s32.totalorder %s77_s1, %s77_s1 }
  0x12   :  { %35 = vst [vmem:[#allocation7] sm:$0xff] %v33_v6  ;;  %36 = vst [vmem:[#allocation7 + $0x8] sm:$0xff] %v34_v7  ;;  %p84_p8 = por %p83_p7, %p82_p6 }
  0x14   :  { %p85_p9 = pnand %p84_p8, %p78_p5 }
  0x16   :  { %88 = shalt.err (!%p85_p9)
}
  0x17   :  { %46 = dma.vmem_to_hbm [thread:$0]  %s44_s17, 256, %s130_s2, [#allocation6]  }
  0x18   :  { %99 = dma.done.wait [#allocation6], 256  }
  0x19   :  { %100 = vsyncadd [#allocation6], 4294967040 }
  0x1a   :  { %50 = vsyncpa [#allocation5], 1 }
  0x1b   :  { %51 = vsyncpa [#allocation6], 1 }

</bundles_post_ra>
